<compile_context>
chip_gen: v7x
topology: tpu7x:2x2x1
jax: 0.10.0
libtpu: 0.0.40
codegen_flags: <defaults>
</compile_context>

<pallas_src>
import functools

import jax
import jax.numpy as jnp
from jax.experimental import pallas as pl
from jax.experimental.pallas import tpu as pltpu

BN_EPS = 1e-5
LANE = 128
_VMEM_LIMIT = 32 * 1024 * 1024


def _round_up(x, m):
    return (x + m - 1) // m * m


def _prep_layer_params(w, gamma, beta, compute_dtype):
    """w: (Cout, Cin) -> (W^T padded (Cin_p, Cout_p) in compute dtype, gamma/beta packed (2, Cout_p) f32)."""
    cout, cin = w.shape
    cin_p, cout_p = _round_up(cin, LANE), _round_up(cout, LANE)
    wt = jnp.zeros((cin_p, cout_p), compute_dtype)
    wt = wt.at[:cin, :cout].set(jnp.transpose(w).astype(compute_dtype))
    gb = jnp.zeros((2, cout_p), jnp.float32)           # padded channels: gamma=0, beta=0 -> stay 0
    gb = gb.at[0, :cout].set(gamma.astype(jnp.float32))
    gb = gb.at[1, :cout].set(beta.astype(jnp.float32))
    return wt, gb


# --------------------------------------------------------------------------------------
# Fused path: whole PBlock in one pallas_call (small working sets; intermediates in VMEM)
# --------------------------------------------------------------------------------------
def _pblock_fused_kernel(*refs, n_layers, inv_m, compute_dtype):
    o_ref = refs[-1]
    h = refs[0][...]                                   # (M, C0_p), compute dtype
    for li in range(n_layers):
        wt = refs[1 + 2 * li][...]                     # (Cin_p, Cout_p), compute dtype
        gb = refs[2 + 2 * li][...]                     # (2, Cout_p), f32
        # Linear (bias dropped: cancelled by train-mode BN), f32 accumulation on the MXU.
        z = jnp.dot(h.astype(compute_dtype), wt, preferred_element_type=jnp.float32)
        # One-pass BN stats over the rows (biased variance), folded into scale/shift.
        s = jnp.sum(z, axis=0, keepdims=True)
        sq = jnp.sum(z * z, axis=0, keepdims=True)
        mean = s * inv_m
        var = sq * inv_m - mean * mean
        inv_std = jax.lax.rsqrt(var + BN_EPS)
        scale = gb[0:1, :] * inv_std
        shift = gb[1:2, :] - mean * scale
        h = jnp.maximum(z * scale + shift, 0.0)        # BN affine + ReLU (2 VALU + max per elem)
    o_ref[...] = h.astype(o_ref.dtype)


def _pblock_fused(x2d, prepped, compute_dtype):
    m_real, cin = x2d.shape
    cin_p = prepped[0][0].shape[0]
    cout_p_last = prepped[-1][0].shape[1]

    x_p = jnp.zeros((m_real, cin_p), compute_dtype)
    x_p = x_p.at[:, :cin].set(x2d.astype(compute_dtype))

    args = [x_p]
    flops = 0
    trans = 0
    nbytes = x_p.size * jnp.dtype(compute_dtype).itemsize + m_real * cout_p_last * 4
    for wt, gb in prepped:
        args += [wt, gb]
        flops += 2 * m_real * wt.shape[0] * wt.shape[1] + 5 * m_real * wt.shape[1]
        trans += wt.shape[1]
        nbytes += wt.size * jnp.dtype(wt.dtype).itemsize + gb.size * 4

    vmem = pl.BlockSpec(memory_space=pltpu.MemorySpace.VMEM)
    out = pl.pallas_call(
        functools.partial(_pblock_fused_kernel, n_layers=len(prepped),
                          inv_m=1.0 / m_real, compute_dtype=compute_dtype),
        out_shape=jax.ShapeDtypeStruct((m_real, cout_p_last), jnp.float32),
        in_specs=[vmem] * len(args),
        out_specs=vmem,
        compiler_params=pltpu.CompilerParams(vmem_limit_bytes=_VMEM_LIMIT),
        cost_estimate=pl.CostEstimate(flops=int(flops), transcendentals=int(trans),
                                      bytes_accessed=int(nbytes)),
    )(*args)
    return out


def _fused_fits(m_real, cin, prepped, budget=6 * 1024 * 1024):
    cmax = max([_round_up(cin, LANE)] + [wt.shape[1] for wt, _ in prepped])
    wbytes = sum(wt.size * jnp.dtype(wt.dtype).itemsize + gb.size * 4 for wt, gb in prepped)
    return 3 * m_real * cmax * 4 + wbytes <= budget


# --------------------------------------------------------------------------------------
# Tiled path: per layer, two pipelined passes over M tiles (scales to M >> VMEM)
# --------------------------------------------------------------------------------------
def _stats_matmul_kernel(x_ref, wt_ref, gb_ref, z_ref, ss_ref, sum_ref, sq_ref, *, inv_m):
    i = pl.program_id(0)

    @pl.when(i == 0)
    def _init():
        sum_ref[...] = jnp.zeros_like(sum_ref)
        sq_ref[...] = jnp.zeros_like(sq_ref)

    # Linear on this M tile (bias dropped); zero-padded rows/channels contribute 0 to the sums.
    z = jnp.dot(x_ref[...], wt_ref[...], preferred_element_type=jnp.float32)
    z_ref[...] = z
    sum_ref[...] += jnp.sum(z, axis=0, keepdims=True)
    sq_ref[...] += jnp.sum(z * z, axis=0, keepdims=True)

    @pl.when(i == pl.num_programs(0) - 1)
    def _finalize():
        gb = gb_ref[...]
        mean = sum_ref[...] * inv_m                     # 1/M_real precomputed at trace time
        var = sq_ref[...] * inv_m - mean * mean         # one-pass biased variance
        inv_std = jax.lax.rsqrt(var + BN_EPS)           # EUP, Cout-wide only
        scale = gb[0:1, :] * inv_std
        shift = gb[1:2, :] - mean * scale
        ss_ref[0:1, :] = scale
        ss_ref[1:2, :] = shift


def _bn_relu_kernel(z_ref, ss_ref, o_ref, *, tile_m, m_real, mask_rows):
    ss = ss_ref[...]
    y = jnp.maximum(z_ref[...] * ss[0:1, :] + ss[1:2, :], 0.0)
    if mask_rows:
        # Zero padded rows so they stay exactly 0 for the next layer's statistics.
        row = jax.lax.broadcasted_iota(jnp.int32, y.shape, 0) + pl.program_id(0) * tile_m
        y = jnp.where(row < m_real, y, 0.0)
    o_ref[...] = y.astype(o_ref.dtype)


def _pblock_layer_tiled(h_p, wt, gb, m_real, tile_m, out_dtype):
    m_pad, cin_p = h_p.shape
    cout_p = wt.shape[1]
    n_tiles = m_pad // tile_m
    in_isz = jnp.dtype(h_p.dtype).itemsize

    # ---- pass 1: matmul + per-channel sum / sum-of-squares -> scale & shift ----
    z, ss = pl.pallas_call(
        functools.partial(_stats_matmul_kernel, inv_m=1.0 / m_real),
        out_shape=[jax.ShapeDtypeStruct((m_pad, cout_p), jnp.float32),
                   jax.ShapeDtypeStruct((2, cout_p), jnp.float32)],
        grid_spec=pltpu.PrefetchScalarGridSpec(
            num_scalar_prefetch=0,
            grid=(n_tiles,),
            in_specs=[pl.BlockSpec((tile_m, cin_p), lambda i: (i, 0)),
                      pl.BlockSpec((cin_p, cout_p), lambda i: (0, 0)),   # weights resident
                      pl.BlockSpec((2, cout_p), lambda i: (0, 0))],      # gamma/beta resident
            out_specs=[pl.BlockSpec((tile_m, cout_p), lambda i: (i, 0)),
                       pl.BlockSpec((2, cout_p), lambda i: (0, 0))],
            scratch_shapes=[pltpu.VMEM((1, cout_p), jnp.float32),
                            pltpu.VMEM((1, cout_p), jnp.float32)]),
        compiler_params=pltpu.CompilerParams(
            dimension_semantics=("arbitrary",),          # carries the sum/sumsq accumulator
            vmem_limit_bytes=_VMEM_LIMIT),
        cost_estimate=pl.CostEstimate(
            flops=int(2 * m_pad * cin_p * cout_p + 3 * m_pad * cout_p),
            transcendentals=int(cout_p),
            bytes_accessed=int(m_pad * cin_p * in_isz + cin_p * cout_p * in_isz
                               + m_pad * cout_p * 4 + 4 * cout_p * 4)),
    )(h_p, wt, gb)

    # ---- pass 2: y = relu(z * scale + shift), padded rows zeroed ----
    mask_rows = m_pad != m_real
    y = pl.pallas_call(
        functools.partial(_bn_relu_kernel, tile_m=tile_m, m_real=m_real, mask_rows=mask_rows),
        out_shape=jax.ShapeDtypeStruct((m_pad, cout_p), out_dtype),
        grid_spec=pltpu.PrefetchScalarGridSpec(
            num_scalar_prefetch=0,
            grid=(n_tiles,),
            in_specs=[pl.BlockSpec((tile_m, cout_p), lambda i: (i, 0)),
                      pl.BlockSpec((2, cout_p), lambda i: (0, 0))],      # scale/shift resident
            out_specs=pl.BlockSpec((tile_m, cout_p), lambda i: (i, 0))),
        compiler_params=pltpu.CompilerParams(
            dimension_semantics=("parallel",),           # independent tiles -> both TCs on v7x
            vmem_limit_bytes=_VMEM_LIMIT),
        cost_estimate=pl.CostEstimate(
            flops=int(3 * m_pad * cout_p),
            transcendentals=0,
            bytes_accessed=int(m_pad * cout_p * (4 + jnp.dtype(out_dtype).itemsize)
                               + 2 * cout_p * 4)),
    )(z, ss)
    return y


# --------------------------------------------------------------------------------------
# Public forward
# --------------------------------------------------------------------------------------
def pblock_forward(x, params, *, should_perm=True, compute_dtype=jnp.bfloat16,
                   tile_m=512, force_tiled=False):
    """PBlock forward.

    x: (B, N, iu) with should_perm=True, or (B, iu).
    params: list of (w, b, gamma, beta) per sublayer (PyTorch layout, w: (out, in)).
    compute_dtype: dtype fed to the MXU (bf16 recommended); BN math stays f32.
    """
    if x.ndim == 3 and not should_perm:
        # TODO(synk): 3-D input with should_perm=False (BN over the middle axis) not implemented.
        raise NotImplementedError("3-D input requires should_perm=True")
    assert tile_m % 8 == 0

    if x.ndim == 3:
        B, N, C = x.shape
        x2d = x.reshape(B * N, C)
    else:
        N = None
        x2d = x

    # Linear bias (params[i][1]) is intentionally dropped: train-mode BN cancels it exactly.
    prepped = [_prep_layer_params(w, gamma, beta, compute_dtype)
               for (w, _b, gamma, beta) in params]

    m_real, cin = x2d.shape
    cout_last = params[-1][0].shape[0]

    if (not force_tiled) and _fused_fits(m_real, cin, prepped):
        out_p = _pblock_fused(x2d, prepped, compute_dtype)
    else:
        m_pad = _round_up(max(m_real, tile_m), tile_m)
        cin_p = prepped[0][0].shape[0]
        h_p = jnp.zeros((m_pad, cin_p), compute_dtype)
        h_p = h_p.at[:m_real, :cin].set(x2d.astype(compute_dtype))
        for li, (wt, gb) in enumerate(prepped):
            out_dtype = jnp.float32 if li == len(prepped) - 1 else compute_dtype
            h_p = _pblock_layer_tiled(h_p, wt, gb, m_real, tile_m, out_dtype)
        out_p = h_p[:m_real]

    out = out_p[:, :cout_last]
    if N is not None:
        out = out.reshape(B, N, cout_last)
    return out


# --------------------------------------------------------------------------------------
# Params + references
# --------------------------------------------------------------------------------------
def init_pblock_params(key, iu, units):
    """Deterministic synthetic init (PyTorch shapes; gamma/beta randomized to exercise BN affine)."""
    params = []
    ux = iu
    for uy in units:
        key, kw, kb, kg, kbe = jax.random.split(key, 5)
        bound = 1.0 / float(ux) ** 0.5
        w = jax.random.uniform(kw, (uy, ux), jnp.float32, -bound, bound)
        b = jax.random.uniform(kb, (uy,), jnp.float32, -bound, bound)
        gamma = jax.random.uniform(kg, (uy,), jnp.float32, 0.5, 1.5)
        beta = 0.1 * jax.random.normal(kbe, (uy,), jnp.float32)
        params.append((w, b, gamma, beta))
        ux = uy
    return params


def pblock_reference(x, params):
    """Pure-JAX f32 reference of the PyTorch forward (training-mode BN stats, bias included)."""
    h = x
    red = tuple(range(h.ndim - 1))
    for (w, b, gamma, beta) in params:
        h = jnp.einsum("...c,oc->...o", h, w) + b
        mean = jnp.mean(h, axis=red, keepdims=True)
        var = jnp.mean((h - mean) ** 2, axis=red, keepdims=True)
        h = gamma * (h - mean) * jax.lax.rsqrt(var + BN_EPS) + beta
        h = jnp.maximum(h, 0.0)
    return h


def pblock_reference_matched(x, params, compute_dtype=jnp.bfloat16):
    """Same math, but with the kernel's bf16-input / f32-accumulate matmuls (BN math in f32)."""
    h = x
    red = tuple(range(h.ndim - 1))
    for (w, b, gamma, beta) in params:
        h = jnp.einsum("...c,oc->...o", h.astype(compute_dtype), w.astype(compute_dtype),
                       preferred_element_type=jnp.float32) + b
        mean = jnp.mean(h, axis=red, keepdims=True)
        var = jnp.mean((h - mean) ** 2, axis=red, keepdims=True)
        h = gamma * (h - mean) * jax.lax.rsqrt(var + BN_EPS) + beta
        h = jnp.maximum(h, 0.0)
    return h


if __name__ == "__main__":
    key = jax.random.PRNGKey(0)
    kx1, kx2, kp = jax.random.split(key, 3)

    # PBlock(iu=32, 64, 32, should_perm=True)
    IU, UNITS = 32, (64, 32)
    params = init_pblock_params(kp, IU, UNITS)

    # ---- test 1: fused single-call path, bf16 MXU inputs (default) ----
    x1 = jax.random.normal(kx1, (2, 8, IU), jnp.float32)          # (B=2, N=8, iu=32)
    out1 = jax.block_until_ready(pblock_forward(x1, params))
    assert out1.shape == (2, 8, UNITS[-1]), out1.shape
    ref1_matched = pblock_reference_matched(x1, params)
    ref1_exact = pblock_reference(x1, params)
    assert jnp.allclose(out1, ref1_matched, atol=1e-2, rtol=1e-2), \
        float(jnp.max(jnp.abs(out1 - ref1_matched)))
    assert jnp.allclose(out1, ref1_exact, atol=1e-1, rtol=1e-1), \
        float(jnp.max(jnp.abs(out1 - ref1_exact)))

    # ---- test 2: fused path, f32 matmul -> tight match to the exact reference ----
    out2 = jax.block_until_ready(pblock_forward(x1, params, compute_dtype=jnp.float32))
    assert jnp.allclose(out2, ref1_exact, atol=5e-4, rtol=5e-4), \
        float(jnp.max(jnp.abs(out2 - ref1_exact)))

    # ---- test 3: tiled two-pass path (grid over M, padded + masked rows), f32 ----
    x2 = jax.random.normal(kx2, (2, 7, IU), jnp.float32)          # M=14 -> padded to 16, tile_m=8
    ref2_exact = pblock_reference(x2, params)
    out3 = jax.block_until_ready(
        pblock_forward(x2, params, compute_dtype=jnp.float32, tile_m=8, force_tiled=True))
    assert out3.shape == (2, 7, UNITS[-1]), out3.shape
    assert jnp.allclose(out3, ref2_exact, atol=5e-4, rtol=5e-4), \
        float(jnp.max(jnp.abs(out3 - ref2_exact)))

    # ---- test 4: tiled path with bf16 MXU inputs ----
    ref2_matched = pblock_reference_matched(x2, params)
    out4 = jax.block_until_ready(
        pblock_forward(x2, params, tile_m=8, force_tiled=True))
    assert jnp.allclose(out4, ref2_matched, atol=1e-2, rtol=1e-2), \
        float(jnp.max(jnp.abs(out4 - ref2_matched)))

    print("KERNEL_OK")
</pallas_src>

<mosaic_0001>
module attributes {stable_mosaic.version = 11 : i64} {
  func.func @_pblock_fused_kernel(%arg0: memref<16x128xbf16, #tpu.memory_space<vmem>>, %arg1: memref<128x128xbf16, #tpu.memory_space<vmem>>, %arg2: memref<2x128xf32, #tpu.memory_space<vmem>>, %arg3: memref<128x128xbf16, #tpu.memory_space<vmem>>, %arg4: memref<2x128xf32, #tpu.memory_space<vmem>>, %arg5: memref<16x128xf32, #tpu.memory_space<vmem>>) attributes {dimension_semantics = [], scalar_prefetch = 0 : i64, scratch_operands = 0 : i64, tpu.core_type = #tpu.core_type<tc>} {
    %c0 = arith.constant 0 : index
    %c0_0 = arith.constant 0 : index
    %0 = vector.load %arg0[%c0, %c0_0] : memref<16x128xbf16, #tpu.memory_space<vmem>>, vector<16x128xbf16>
    %c0_1 = arith.constant 0 : index
    %c0_2 = arith.constant 0 : index
    %1 = vector.load %arg1[%c0_1, %c0_2] : memref<128x128xbf16, #tpu.memory_space<vmem>>, vector<128x128xbf16>
    %c0_3 = arith.constant 0 : index
    %c0_4 = arith.constant 0 : index
    %2 = vector.load %arg2[%c0_3, %c0_4] : memref<2x128xf32, #tpu.memory_space<vmem>>, vector<2x128xf32>
    %cst = arith.constant dense<0.000000e+00> : vector<16x128xf32>
    %3 = tpu.matmul %0, %1, %cst {dimension_numbers = #tpu.dot_dimension_numbers<[1], [0], [0], [1], [0, 0, 1, 1], [], []>} : vector<16x128xbf16>, vector<128x128xbf16>, vector<16x128xf32> -> vector<16x128xf32>
    %cst_5 = arith.constant dense<0.000000e+00> : vector<128xf32>
    %4 = vector.multi_reduction <add>, %3, %cst_5 [0] : vector<16x128xf32> to vector<128xf32>
    %5 = vector.shape_cast %4 : vector<128xf32> to vector<1x128xf32>
    %6 = arith.mulf %3, %3 : vector<16x128xf32>
    %cst_6 = arith.constant dense<0.000000e+00> : vector<128xf32>
    %7 = vector.multi_reduction <add>, %6, %cst_6 [0] : vector<16x128xf32> to vector<128xf32>
    %8 = vector.shape_cast %7 : vector<128xf32> to vector<1x128xf32>
    %cst_7 = arith.constant 6.250000e-02 : f32
    %9 = vector.broadcast %cst_7 : f32 to vector<1x128xf32>
    %10 = arith.mulf %5, %9 : vector<1x128xf32>
    %cst_8 = arith.constant 6.250000e-02 : f32
    %11 = vector.broadcast %cst_8 : f32 to vector<1x128xf32>
    %12 = arith.mulf %8, %11 : vector<1x128xf32>
    %13 = arith.mulf %10, %10 : vector<1x128xf32>
    %14 = arith.subf %12, %13 : vector<1x128xf32>
    %cst_9 = arith.constant 9.99999974E-6 : f32
    %15 = vector.broadcast %cst_9 : f32 to vector<1x128xf32>
    %16 = arith.addf %14, %15 : vector<1x128xf32>
    %17 = math.rsqrt %16 : vector<1x128xf32>
    %18 = vector.extract_strided_slice %2 {offsets = [0, 0], sizes = [1, 128], strides = [1, 1]} : vector<2x128xf32> to vector<1x128xf32>
    %19 = arith.mulf %18, %17 : vector<1x128xf32>
    %20 = vector.extract_strided_slice %2 {offsets = [1, 0], sizes = [1, 128], strides = [1, 1]} : vector<2x128xf32> to vector<1x128xf32>
    %21 = arith.mulf %10, %19 : vector<1x128xf32>
    %22 = arith.subf %20, %21 : vector<1x128xf32>
    %23 = vector.broadcast %19 : vector<1x128xf32> to vector<16x128xf32>
    %24 = arith.mulf %3, %23 : vector<16x128xf32>
    %25 = vector.broadcast %22 : vector<1x128xf32> to vector<16x128xf32>
    %26 = arith.addf %24, %25 : vector<16x128xf32>
    %cst_10 = arith.constant 0.000000e+00 : f32
    %27 = vector.broadcast %cst_10 : f32 to vector<16x128xf32>
    %28 = arith.maximumf %26, %27 : vector<16x128xf32>
    %c0_11 = arith.constant 0 : index
    %c0_12 = arith.constant 0 : index
    %29 = vector.load %arg3[%c0_11, %c0_12] : memref<128x128xbf16, #tpu.memory_space<vmem>>, vector<128x128xbf16>
    %c0_13 = arith.constant 0 : index
    %c0_14 = arith.constant 0 : index
    %30 = vector.load %arg4[%c0_13, %c0_14] : memref<2x128xf32, #tpu.memory_space<vmem>>, vector<2x128xf32>
    %31 = arith.truncf %28 : vector<16x128xf32> to vector<16x128xbf16>
    %cst_15 = arith.constant dense<0.000000e+00> : vector<16x128xf32>
    %32 = tpu.matmul %31, %29, %cst_15 {dimension_numbers = #tpu.dot_dimension_numbers<[1], [0], [0], [1], [0, 0, 1, 1], [], []>} : vector<16x128xbf16>, vector<128x128xbf16>, vector<16x128xf32> -> vector<16x128xf32>
    %cst_16 = arith.constant dense<0.000000e+00> : vector<128xf32>
    %33 = vector.multi_reduction <add>, %32, %cst_16 [0] : vector<16x128xf32> to vector<128xf32>
    %34 = vector.shape_cast %33 : vector<128xf32> to vector<1x128xf32>
    %35 = arith.mulf %32, %32 : vector<16x128xf32>
    %cst_17 = arith.constant dense<0.000000e+00> : vector<128xf32>
    %36 = vector.multi_reduction <add>, %35, %cst_17 [0] : vector<16x128xf32> to vector<128xf32>
    %37 = vector.shape_cast %36 : vector<128xf32> to vector<1x128xf32>
    %cst_18 = arith.constant 6.250000e-02 : f32
    %38 = vector.broadcast %cst_18 : f32 to vector<1x128xf32>
    %39 = arith.mulf %34, %38 : vector<1x128xf32>
    %cst_19 = arith.constant 6.250000e-02 : f32
    %40 = vector.broadcast %cst_19 : f32 to vector<1x128xf32>
    %41 = arith.mulf %37, %40 : vector<1x128xf32>
    %42 = arith.mulf %39, %39 : vector<1x128xf32>
    %43 = arith.subf %41, %42 : vector<1x128xf32>
    %cst_20 = arith.constant 9.99999974E-6 : f32
    %44 = vector.broadcast %cst_20 : f32 to vector<1x128xf32>
    %45 = arith.addf %43, %44 : vector<1x128xf32>
    %46 = math.rsqrt %45 : vector<1x128xf32>
    %47 = vector.extract_strided_slice %30 {offsets = [0, 0], sizes = [1, 128], strides = [1, 1]} : vector<2x128xf32> to vector<1x128xf32>
    %48 = arith.mulf %47, %46 : vector<1x128xf32>
    %49 = vector.extract_strided_slice %30 {offsets = [1, 0], sizes = [1, 128], strides = [1, 1]} : vector<2x128xf32> to vector<1x128xf32>
    %50 = arith.mulf %39, %48 : vector<1x128xf32>
    %51 = arith.subf %49, %50 : vector<1x128xf32>
    %52 = vector.broadcast %48 : vector<1x128xf32> to vector<16x128xf32>
    %53 = arith.mulf %32, %52 : vector<16x128xf32>
    %54 = vector.broadcast %51 : vector<1x128xf32> to vector<16x128xf32>
    %55 = arith.addf %53, %54 : vector<16x128xf32>
    %cst_21 = arith.constant 0.000000e+00 : f32
    %56 = vector.broadcast %cst_21 : f32 to vector<16x128xf32>
    %57 = arith.maximumf %55, %56 : vector<16x128xf32>
    %c0_22 = arith.constant 0 : index
    %c0_23 = arith.constant 0 : index
    %58 = vector.load %arg5[%c0_22, %c0_23] : memref<16x128xf32, #tpu.memory_space<vmem>>, vector<16x128xf32>
    tpu.vector_store %arg5[%c0_22, %c0_23], %57 {strides = array<i32>} : memref<16x128xf32, #tpu.memory_space<vmem>>, vector<16x128xf32>,
    return
  }
}

</mosaic_0001>

<bundles_post_ra>
// kernel: tpu_custom_call.1
= control target key start
LH: loop header
LB: loop body
LE: loop exit
PB: predicated region body
PF: predicated region fallthrough
CT: control target
= control target key end

     0   :  { %10 = vsyncpa [#allocation3], 0  ;;  %s698_s0 = inlined_call_operand.hbm [shape: bf16[16,128], index: 0, kind: input, shape index: {}]   ;;  %s699_s1 = inlined_call_operand.hbm [shape: bf16[128,128], index: 1, kind: input, shape index: {}]   ;;  %s700_s2 = inlined_call_operand.vmem [shape: f32[2,128], index: 2, kind: input, shape index: {}]   ;;  %s701_s3 = inlined_call_operand.hbm [shape: bf16[128,128], index: 3, kind: input, shape index: {}]   ;;  %s702_s4 = inlined_call_operand.vmem [shape: f32[2,128], index: 4, kind: input, shape index: {}]   ;;  %s703_s5 = inlined_call_operand.hbm [shape: f32[16,128], index: 5, kind: output, shape index: {}]  }
   0x1   :  { %11 = vsyncpa [#allocation6], 0 }
   0x2   :  { %12 = vsyncpa [#allocation4], 0  ;;  %s588_s18 = smov [#allocation5]   ;;  %s589_s20 = smov [#allocation2]  }
   0x3   :  { %s30_s19 = sshll.u32 %s588_s18, 4  ;;  %s18_s21 = sshll.u32 %s589_s20, 4  ;;  %s31_s19 = int_to_ptr.vmem [resolvable:$true] %s30_s19  ;;  %s628_s21 = int_to_ptr.vmem [resolvable:$true] %s18_s21 }
   0x4   :  { %s494_s24 = scalar_lea.hbm %s699_s1, 1024 }
   0x5   :  { %p495_p0 = scmp.ne.s32.totalorder %s699_s1, %s494_s24  ;;  %p498_p1 = scmp.lt.u32.totalorder %s494_s24, %s699_s1 }
   0x7   :  { %p500_p2 = pnand %p498_p1, %p495_p0 }
   0x9   :  { %503 = shalt.err (!%p500_p2)
}
   0xa   :  { %s504_s29 = scalar_lea.vmem %s31_s19, 1024  ;;  %p509_p4 = scmp.lt.s32.totalorder %s31_s19, %s31_s19 }
   0xb   :  { %p505_p3 = scmp.ne.s32.totalorder %s31_s19, %s504_s29  ;;  %p510_p5 = scmp.lt.s32.totalorder %s504_s29, %s504_s29 }
   0xd   :  { %p511_p6 = por %p510_p5, %p509_p4 }
   0xf   :  { %p512_p7 = pnand %p511_p6, %p505_p3 }
  0x11   :  { %515 = shalt.err (!%p512_p7)
}
  0x12   :  { %s590_s30 = smov 64   ;;  %s591_s6 = smov 4  }
  0x13   :  { %36 = dma.hbm_to_vmem [thread:$0]  %s699_s1, 1024, %s31_s19, [#allocation6], %s590_s30, %s590_s30, %s591_s6  }
  0x14   :  { %s516_s11 = scalar_lea.hbm %s698_s0, 128 }
  0x15   :  { %p517_p8 = scmp.ne.s32.totalorder %s698_s0, %s516_s11  ;;  %p520_p9 = scmp.lt.u32.totalorder %s516_s11, %s698_s0 }
  0x17   :  { %p522_p10 = pnand %p520_p9, %p517_p8 }
  0x19   :  { %525 = shalt.err (!%p522_p10)
}
  0x1a   :  { %s526_s16 = scalar_lea.vmem %s628_s21, 128  ;;  %p531_p12 = scmp.lt.s32.totalorder %s628_s21, %s628_s21 }
  0x1b   :  { %p527_p11 = scmp.ne.s32.totalorder %s628_s21, %s526_s16  ;;  %p532_p13 = scmp.lt.s32.totalorder %s526_s16, %s526_s16 }
  0x1d   :  { %p533_p0 = por %p532_p13, %p531_p12 }
  0x1f   :  { %p534_p1 = pnand %p533_p0, %p527_p11 }
  0x21   :  { %537 = shalt.err (!%p534_p1)
}
  0x22   :  { %24 = dma.hbm_to_vmem [thread:$0]  %s698_s0, 128, %s628_s21, [#allocation3], %s590_s30, %s590_s30, %s591_s6  }
  0x23   :  { %s592_s18 = smov [#allocation7]   ;;  %s538_s23 = scalar_lea.hbm %s701_s3, 1024 }
  0x24   :  { %s44_s19 = sshll.u32 %s592_s18, 4  ;;  %p539_p2 = scmp.ne.s32.totalorder %s701_s3, %s538_s23  ;;  %s45_s19 = int_to_ptr.vmem [resolvable:$true] %s44_s19 }
  0x25   :  { %p542_p3 = scmp.lt.u32.totalorder %s538_s23, %s701_s3 }
  0x27   :  { %p544_p4 = pnand %p542_p3, %p539_p2 }
  0x29   :  { %547 = shalt.err (!%p544_p4)
}
  0x2a   :  { %s548_s28 = scalar_lea.vmem %s45_s19, 1024  ;;  %p553_p6 = scmp.lt.s32.totalorder %s45_s19, %s45_s19 }
  0x2b   :  { %p549_p5 = scmp.ne.s32.totalorder %s45_s19, %s548_s28  ;;  %p554_p7 = scmp.lt.s32.totalorder %s548_s28, %s548_s28 }
  0x2d   :  { %p555_p8 = por %p554_p7, %p553_p6 }
  0x2f   :  { %p556_p9 = pnand %p555_p8, %p549_p5 }
  0x31   :  { %559 = shalt.err (!%p556_p9)
}
  0x32   :  { %50 = dma.hbm_to_vmem [thread:$0]  %s701_s3, 1024, %s45_s19, [#allocation6], %s590_s30, %s590_s30, %s591_s6  }
  0x33   :  { %582 = dma.done.wait [#allocation3], 128  }
  0x34   :  { %583 = vsyncadd [#allocation3], 4294967168 }
  0x35   :  { %584 = dma.done.wait [#allocation6], 2048  }
  0x36   :  { %585 = vsyncadd [#allocation6], 4294965248  ;;  %v593_v0 = vmov 0.0   ;;  %vm594_vm0 = vmmov 0   ;;  %v473_v1 = vld [vmem:[#allocation5] sm:$0xff]   ;;  %v474_v2 = vld [vmem:[#allocation5 + $0x8] sm:$0xff]   ;;  %v205_v43 = vlaneseq }
  0x37   :  { %423 = vmatprep.subr.bf16.mxu0 %v593_v0  ;;  %439 = vmatprep.mubr.msk.bf16.mxu0 %vm594_vm0, %v593_v0  ;;  %v475_v3 = vld [vmem:[#allocation5 + $0x10] sm:$0xff]   ;;  %v476_v4 = vld [vmem:[#allocation5 + $0x18] sm:$0xff]   ;;  %v477_v5 = vld [vmem:[#allocation5 + $0x20] sm:$0xff]   ;;  %s595_s6 = smov [#allocation8]  }
  0x38   :  { %443 = vmatprep.subr.bf16.mxu1 %v593_v0  ;;  %459 = vmatprep.mubr.msk.bf16.mxu1 %vm594_vm0, %v593_v0  ;;  %v478_v6 = vld [vmem:[#allocation5 + $0x28] sm:$0xff]   ;;  %v479_v7 = vld [vmem:[#allocation5 + $0x30] sm:$0xff]   ;;  %v480_v8 = vld [vmem:[#allocation5 + $0x38] sm:$0xff]   ;;  %v206_v44 = vshrl.u32 %v205_v43, 7  ;;  %s375_s7 = sshll.u32 %s595_s6, 4  ;;  %s376_s7 = int_to_ptr.vmem [resolvable:$true] %s375_s7 }
  0x39   :  { %424 = vmatpush3.bf16.msra.mxu0 %v473_v1  ;;  %v481_v9 = vld [vmem:[#allocation2] sm:$0xff]   ;;  %v482_v10 = vld [vmem:[#allocation7] sm:$0xff]   ;;  %v483_v11 = vld [vmem:[#allocation7 + $0x8] sm:$0xff]   ;;  %s560_s8 = scalar_lea.vmem %s376_s7, 256  ;;  %p565_p11 = scmp.lt.s32.totalorder %s376_s7, %s376_s7 }
  0x3a   :  { %425 = vmatprep.subr.bf16.mxu0 %v593_v0  ;;  %444 = vmatpush3.bf16.msra.mxu1 %v482_v10  ;;  %v484_v12 = vld [vmem:[#allocation7 + $0x10] sm:$0xff]   ;;  %v485_v13 = vld [vmem:[#allocation7 + $0x18] sm:$0xff]   ;;  %v486_v14 = vld [vmem:[#allocation7 + $0x20] sm:$0xff]   ;;  %v207_v46 = vsub.s32 0, %v206_v44  ;;  %v213_v54 = vsub.s32 1, %v206_v44  ;;  %p561_p10 = scmp.ne.s32.totalorder %s376_s7, %s560_s8  ;;  %p566_p12 = scmp.lt.s32.totalorder %s560_s8, %s560_s8 }
  0x3b   :  { %445 = vmatprep.subr.bf16.mxu1 %v593_v0  ;;  %v487_v15 = vld [vmem:[#allocation7 + $0x28] sm:$0xff]   ;;  %v488_v16 = vld [vmem:[#allocation7 + $0x30] sm:$0xff]   ;;  %v489_v17 = vld [vmem:[#allocation7 + $0x38] sm:$0xff]  }
  0x3c   :  { %v81_v45 = vld [vmem:[%s700_s2] sm:$0x3]  ;;  %p567_p13 = por %p566_p12, %p565_p11 }
  0x3d   :  { %426 = vmatpush3.bf16.msra.mxu0 %v474_v2 }
  0x3e   :  { %427 = vmatprep.subr.bf16.mxu0 %v593_v0  ;;  %446 = vmatpush3.bf16.msra.mxu1 %v483_v11  ;;  %p568_p0 = pnand %p567_p13, %p561_p10 }
  0x3f   :  { %447 = vmatprep.subr.bf16.mxu1 %v593_v0 }
  0x41   :  { %428 = vmatpush3.bf16.msra.mxu0 %v475_v3 }
  0x42   :  { %429 = vmatprep.subr.bf16.mxu0 %v593_v0  ;;  %448 = vmatpush3.bf16.msra.mxu1 %v484_v12 }
  0x43   :  { %449 = vmatprep.subr.bf16.mxu1 %v593_v0 }
  0x45   :  { %430 = vmatpush3.bf16.msra.mxu0 %v476_v4 }
  0x46   :  { %431 = vmatprep.subr.bf16.mxu0 %v593_v0  ;;  %450 = vmatpush3.bf16.msra.mxu1 %v485_v13 }
  0x47   :  { %451 = vmatprep.subr.bf16.mxu1 %v593_v0 }
  0x49   :  { %432 = vmatpush3.bf16.msra.mxu0 %v477_v5 }
  0x4a   :  { %433 = vmatprep.subr.bf16.mxu0 %v593_v0  ;;  %452 = vmatpush3.bf16.msra.mxu1 %v486_v14 }
  0x4b   :  { %453 = vmatprep.subr.bf16.mxu1 %v593_v0 }
  0x4d   :  { %434 = vmatpush3.bf16.msra.mxu0 %v478_v6 }
  0x4e   :  { %435 = vmatprep.subr.bf16.mxu0 %v593_v0  ;;  %454 = vmatpush3.bf16.msra.mxu1 %v487_v15 }
  0x4f   :  { %455 = vmatprep.subr.bf16.mxu1 %v593_v0 }
  0x51   :  { %436 = vmatpush3.bf16.msra.mxu0 %v479_v7 }
  0x52   :  { %437 = vmatprep.subr.bf16.mxu0 %v593_v0  ;;  %456 = vmatpush3.bf16.msra.mxu1 %v488_v16 }
  0x53   :  { %457 = vmatprep.subr.bf16.mxu1 %v593_v0 }
  0x55   :  { %438 = vmatpush3.bf16.msra.mxu0 %v480_v8 }
  0x56   :  { %458 = vmatpush3.bf16.msra.mxu1 %v489_v17 }
  0x58   :  { %440 = vmatmul.mubr.bf16.vlgmr.msra.gmra.mrb[0].mxu0 %v481_v9 }
 0x12b   :  { %v170_v18 = vpop.f32.mrb[0].mxu0 }
 0x12c   :  { %v441_v19 = vpop.f32.mrb[1].mxu0  ;;  %v184_v21 = vmul.f32 %v170_v18, %v170_v18 }
 0x12d   :  { %v173_v20 = vpop.f32.mrb[2].mxu0 }
 0x12e   :  { %v177_v22 = vadd.f32 %v173_v20, %v170_v18  ;;  %v185_v23 = vmul.f32 %v173_v20, %v173_v20  ;;  %v442_v24 = vpop.f32.mrb[3].mxu0 }
 0x130   :  { %v178_v25 = vrot.slane %v177_v22, 4  ;;  %v186_v26 = vadd.f32 %v185_v23, %v184_v21  ;;  %v235_v23 = vld [vmem:[%s702_s4] sm:$0x3] }
 0x132   :  { %v179_v27 = vadd.f32 %v178_v25, %v177_v22  ;;  %v187_v28 = vrot.slane %v186_v26, 4 }
 0x134   :  { %v180_v29 = vrot.slane %v179_v27, 2  ;;  %v188_v30 = vadd.f32 %v187_v28, %v186_v26 }
 0x136   :  { %v181_v31 = vadd.f32 %v180_v29, %v179_v27  ;;  %v189_v32 = vrot.slane %v188_v30, 2 }
 0x138   :  { %v182_v33 = vrot.slane %v181_v31, 1  ;;  %v190_v34 = vadd.f32 %v189_v32, %v188_v30 }
 0x13a   :  { %v183_v35 = vadd.f32 %v182_v33, %v181_v31  ;;  %v191_v36 = vrot.slane %v190_v34, 1 }
 0x13c   :  { %v192_v37 = vadd.f32 %v191_v36, %v190_v34  ;;  %v193_v38 = vmul.f32 0.0625, %v183_v35 }
 0x13e   :  { %v194_v39 = vmul.f32 0.0625, %v192_v37  ;;  %v195_v40 = vmul.f32 %v193_v38, %v193_v38 }
 0x140   :  { %v196_v41 = vsub.f32 %v194_v39, %v195_v40 }
 0x142   :  { %v197_v42 = vadd.f32 1e-05, %v196_v41 }
 0x144   :  { %490 = vrsqrt.f32 %v197_v42 }
 0x14e   :  { %v491_v47 = vpop.eup %490 }
 0x14f   :  { %v199_v48 = vmul.f32 %v491_v47, %v81_v45 }
 0x151   :  { %v200_v49 = vmul.f32 %v199_v48, %v193_v38  ;;  %v208_v50 = vrot.slane %v199_v48, %v207_v46 }
 0x153   :  { %v202_v51 = vrot.slane %v200_v49, 7  ;;  %v209_v52 = vmul.f32 %v208_v50, %v170_v18  ;;  %v210_v53 = vmul.f32 %v208_v50, %v173_v20 }
 0x155   :  { %v204_v55 = vsub.f32 %v81_v45, %v202_v51 }
 0x157   :  { %v214_v56 = vrot.slane %v204_v55, %v213_v54 }
 0x159   :  { %v216_v57 = vadd.f32 %v214_v56, %v210_v53  ;;  %v215_v58 = vadd.f32 %v214_v56, %v209_v52 }
 0x15b   :  { %v217_v59 = vmax.f32 %v215_v58, 0.0  ;;  %v218_v60 = vmax.f32 %v216_v57, 0.0 }
 0x15d   :  { %v236_v61 = vpack.c.bf16 %v218_v60, %v217_v59 }
 0x15f   :  { %460 = vmatmul.mubr.bf16.vlgmr.msra.gmra.mrb[0].mxu1 %v236_v61 }
 0x232   :  { %v319_v62 = vpop.f32.mrb[0].mxu1 }
 0x233   :  { %v461_v63 = vpop.f32.mrb[1].mxu1  ;;  %v333_v1 = vmul.f32 %v319_v62, %v319_v62 }
 0x234   :  { %v322_v0 = vpop.f32.mrb[2].mxu1 }
 0x235   :  { %v326_v2 = vadd.f32 %v322_v0, %v319_v62  ;;  %v334_v3 = vmul.f32 %v322_v0, %v322_v0  ;;  %v462_v4 = vpop.f32.mrb[3].mxu1 }
 0x237   :  { %v327_v5 = vrot.slane %v326_v2, 4  ;;  %v335_v6 = vadd.f32 %v334_v3, %v333_v1 }
 0x239   :  { %v328_v7 = vadd.f32 %v327_v5, %v326_v2  ;;  %v336_v8 = vrot.slane %v335_v6, 4 }
 0x23b   :  { %v329_v9 = vrot.slane %v328_v7, 2  ;;  %v337_v10 = vadd.f32 %v336_v8, %v335_v6 }
 0x23d   :  { %v330_v11 = vadd.f32 %v329_v9, %v328_v7  ;;  %v338_v12 = vrot.slane %v337_v10, 2 }
 0x23f   :  { %v331_v13 = vrot.slane %v330_v11, 1  ;;  %v339_v14 = vadd.f32 %v338_v12, %v337_v10 }
 0x241   :  { %v332_v15 = vadd.f32 %v331_v13, %v330_v11  ;;  %v340_v16 = vrot.slane %v339_v14, 1 }
 0x243   :  { %v341_v17 = vadd.f32 %v340_v16, %v339_v14  ;;  %v342_v18 = vmul.f32 0.0625, %v332_v15 }
 0x245   :  { %v343_v19 = vmul.f32 0.0625, %v341_v17  ;;  %v344_v20 = vmul.f32 %v342_v18, %v342_v18 }
 0x247   :  { %v345_v21 = vsub.f32 %v343_v19, %v344_v20 }
 0x249   :  { %v346_v22 = vadd.f32 1e-05, %v345_v21 }
 0x24b   :  { %492 = vrsqrt.f32 %v346_v22 }
 0x255   :  { %v493_v24 = vpop.eup %492 }
 0x256   :  { %v348_v25 = vmul.f32 %v493_v24, %v235_v23 }
 0x258   :  { %v349_v26 = vmul.f32 %v348_v25, %v342_v18  ;;  %v357_v27 = vrot.slane %v348_v25, %v207_v46 }
 0x25a   :  { %v351_v28 = vrot.slane %v349_v26, 7  ;;  %v358_v29 = vmul.f32 %v357_v27, %v319_v62  ;;  %v359_v30 = vmul.f32 %v357_v27, %v322_v0 }
 0x25c   :  { %v353_v31 = vsub.f32 %v235_v23, %v351_v28 }
 0x25e   :  { %v363_v32 = vrot.slane %v353_v31, %v213_v54 }
 0x260   :  { %v364_v33 = vadd.f32 %v363_v32, %v358_v29  ;;  %v365_v34 = vadd.f32 %v363_v32, %v359_v30 }
 0x262   :  { %v366_v35 = vmax.f32 %v364_v33, 0.0  ;;  %v367_v36 = vmax.f32 %v365_v34, 0.0 }
 0x264   :  { %369 = vst [vmem:[#allocation8 + $0x8] sm:$0xff] %v367_v36  ;;  %368 = vst [vmem:[#allocation8] sm:$0xff] %v366_v35 }
 0x265   :  { %571 = shalt.err (!%p568_p0)
}
 0x266   :  { %s572_s10 = scalar_lea.hbm %s703_s5, 256 }
 0x267   :  { %p573_p1 = scmp.ne.s32.totalorder %s703_s5, %s572_s10  ;;  %p576_p2 = scmp.lt.u32.totalorder %s572_s10, %s703_s5 }
 0x269   :  { %p578_p3 = pnand %p576_p2, %p573_p1 }
 0x26b   :  { %581 = shalt.err (!%p578_p3)
}
 0x26c   :  { %s596_s15 = smov 128   ;;  %s597_s16 = smov 8  }
 0x26d   :  { %381 = dma.vmem_to_hbm [thread:$0]  %s376_s7, 256, %s703_s5, [#allocation4], %s596_s15, %s596_s15, %s597_s16  }
 0x26e   :  { %586 = dma.done.wait [#allocation4], 256  }
 0x26f   :  { %587 = vsyncadd [#allocation4], 4294967040 }
 0x270   :  { %385 = vsyncpa [#allocation3], 1 }
 0x271   :  { %386 = vsyncpa [#allocation6], 1 }
 0x272   :  { %387 = vsyncpa [#allocation4], 1 }

</bundles_post_ra>
